<compile_context>
chip_gen: v7x
topology: tpu7x:2x2x1
jax: 0.10.0
libtpu: 0.0.40
codegen_flags: <defaults>
</compile_context>

<pallas_src>
import jax
import jax.numpy as jnp
from jax.experimental import pallas as pl
from jax.experimental.pallas import tpu as pltpu

_LANE = 128
_TILE_ROWS = 4096                      # (4096, 128) f32 = 2 MiB per operand tile
_TILE_ELEMS = _TILE_ROWS * _LANE       # 1-D ragged-path tile (2 MiB f32)


def _ema_kernel(decay_ref, shadow_ref, x_ref, out_ref):
    # decay lives in SMEM as an f32 scalar; do the multiply-add in f32 and
    # cast only on store so low-precision shadows don't accumulate a biased
    # (rounded) decay every step.
    d = decay_ref[0]
    s = shadow_ref[...].astype(jnp.float32)
    x = x_ref[...].astype(jnp.float32)
    out_ref[...] = (s * d + x * (jnp.float32(1.0) - d)).astype(out_ref.dtype)


def _ema_update_impl(shadow, x, decay):
    """One EMA step: shadow * decay + x * (1 - decay). Returns new shadow."""
    assert shadow.shape == x.shape and shadow.dtype == x.dtype
    orig_shape = x.shape
    orig_dtype = x.dtype
    n = x.size
    itemsize = jnp.dtype(orig_dtype).itemsize

    decay_arr = jnp.full((1,), decay, dtype=jnp.float32)
    cost = pl.CostEstimate(flops=3 * n, transcendentals=0,
                           bytes_accessed=3 * n * itemsize)
    cparams = pltpu.CompilerParams(dimension_semantics=("parallel",))

    if n % _LANE == 0:
        # Aligned (typical NCHW grads): free reshape to a lane-dense 2-D slab.
        rows = n // _LANE
        sf = shadow.reshape(rows, _LANE)
        xf = x.reshape(rows, _LANE)
        tile_rows = _TILE_ROWS if rows > _TILE_ROWS else rows
        grid = (pl.cdiv(rows, tile_rows),)
        out = pl.pallas_call(
            _ema_kernel,
            out_shape=jax.ShapeDtypeStruct((rows, _LANE), orig_dtype),
            grid_spec=pl.GridSpec(
                grid=grid,
                in_specs=[
                    pl.BlockSpec(memory_space=pltpu.MemorySpace.SMEM),   # decay
                    pl.BlockSpec((tile_rows, _LANE), lambda i: (i, 0)),  # shadow
                    pl.BlockSpec((tile_rows, _LANE), lambda i: (i, 0)),  # x
                ],
                out_specs=pl.BlockSpec((tile_rows, _LANE), lambda i: (i, 0)),
            ),
            input_output_aliases={1: 0},   # output aliases the shadow input
            compiler_params=cparams,
            cost_estimate=cost,
        )(decay_arr, sf, xf)
    else:
        # Ragged: 1-D blocked kernel. Pallas pads reads of the final partial
        # block and masks its writeback -> no jnp.pad / output-slice copies.
        sf = shadow.reshape(-1)
        xf = x.reshape(-1)
        tile = _TILE_ELEMS if n > _TILE_ELEMS else n   # multiple of 128 or full dim
        grid = (pl.cdiv(n, tile),)
        out = pl.pallas_call(
            _ema_kernel,
            out_shape=jax.ShapeDtypeStruct((n,), orig_dtype),
            grid_spec=pl.GridSpec(
                grid=grid,
                in_specs=[
                    pl.BlockSpec(memory_space=pltpu.MemorySpace.SMEM),   # decay
                    pl.BlockSpec((tile,), lambda i: (i,)),               # shadow
                    pl.BlockSpec((tile,), lambda i: (i,)),               # x
                ],
                out_specs=pl.BlockSpec((tile,), lambda i: (i,)),
            ),
            input_output_aliases={1: 0},
            compiler_params=cparams,
            cost_estimate=cost,
        )(decay_arr, sf, xf)

    return out.reshape(orig_shape)


# decay is a traced (weak-typed) scalar -> changing its value does NOT
# recompile.  donate_argnums=0 makes the shadow update genuinely in-place.
ema_update = jax.jit(_ema_update_impl, donate_argnums=(0,))


class EMA:
    """JAX/Pallas port of the PyTorch EMA module (stateful wrapper).

    Note: each update donates the previous shadow buffer to the kernel; the
    tensor that seeded the EMA (first non-zero-init call) becomes the shadow
    and is consumed on the next update — don't rely on that old buffer.
    """

    def __init__(self, decay=0.9, zero_initialization=False):
        self.decay = float(decay)
        self.zero_initialization = zero_initialization
        self.shadow = None
        self.initialized = False

    def __call__(self, gradient_tensor):
        gradient_tensor = jnp.asarray(gradient_tensor)
        if not self.initialized:
            self.initialized = True
            if self.zero_initialization:
                self.shadow = jnp.zeros_like(gradient_tensor)
            else:
                # shadow <- x; then x*d + x*(1-d) == x (d + (1-d) == 1 exactly
                # in f32), so skip the redundant first kernel pass entirely.
                self.shadow = gradient_tensor
                return self.shadow
        self.shadow = ema_update(self.shadow, gradient_tensor, self.decay)
        return self.shadow

    # nn.Module-style alias
    forward = __call__

    def get_ema(self):
        return self.shadow if self.initialized else None

    def reset(self):
        self.shadow = None
        self.initialized = False


if __name__ == "__main__":
    key = jax.random.PRNGKey(0)
    k1, k2, k3, k4 = jax.random.split(key, 4)

    # ---- Test 1: small NCHW "gradient" tensors, default init -------------
    x1 = jax.random.normal(k1, (2, 4, 16, 16), dtype=jnp.float32)
    x2 = jax.random.normal(k2, (2, 4, 16, 16), dtype=jnp.float32)

    d = jnp.float32(0.9)
    omd = jnp.float32(1.0) - d
    # References computed (and materialized) BEFORE the EMA runs, because the
    # old shadow buffer (== x1 after step 1) gets donated on step 2.
    ref2 = jax.block_until_ready(x1 * d + x2 * omd)

    ema = EMA(decay=0.9, zero_initialization=False)

    y1 = jax.block_until_ready(ema(x1))   # first call: shadow <- x1 (no kernel)
    assert y1.shape == x1.shape and y1.dtype == x1.dtype
    assert jnp.allclose(y1, x1, atol=1e-6), "first EMA step mismatch"

    y2 = jax.block_until_ready(ema(x2))   # kernel: 0.9*shadow + 0.1*x2 (donates old shadow)
    assert y2.shape == x2.shape and y2.dtype == x2.dtype
    assert jnp.allclose(y2, ref2, atol=1e-6), "second EMA step mismatch"

    # ---- Test 2: zero-init + ragged shape (1-D masked-tail path) ---------
    x3 = jax.random.normal(k3, (3, 5, 7), dtype=jnp.float32)
    ema2 = EMA(decay=0.5, zero_initialization=True)
    y3 = jax.block_until_ready(ema2(x3))
    assert y3.shape == x3.shape
    assert jnp.allclose(y3, jnp.float32(0.5) * x3, atol=1e-6), "zero-init EMA mismatch"

    # ---- Test 3: multi-block aligned path (grid > 1 with partial block) --
    x4 = jax.random.normal(k4, (65, 128, 128), dtype=jnp.float32)  # 8320 rows of 128
    ema3 = EMA(decay=0.8, zero_initialization=True)
    y4 = jax.block_until_ready(ema3(x4))
    ref4 = x4 * (jnp.float32(1.0) - jnp.float32(0.8))
    assert y4.shape == x4.shape
    assert jnp.allclose(y4, ref4, atol=1e-6), "multi-block EMA step mismatch"

    print("KERNEL_OK")
</pallas_src>

<mosaic_0001>
module attributes {stable_mosaic.version = 11 : i64} {
  func.func @_ema_kernel(%arg0: i32, %arg1: memref<1xf32, #tpu.memory_space<smem>>, %arg2: memref<16x128xf32, #tpu.memory_space<vmem>>, %arg3: memref<16x128xf32, #tpu.memory_space<vmem>>, %arg4: memref<16x128xf32, #tpu.memory_space<vmem>>) attributes {dimension_semantics = [#tpu.dimension_semantics<parallel>], iteration_bounds = array<i64: 1>, scalar_prefetch = 0 : i64, scratch_operands = 0 : i64, tpu.core_type = #tpu.core_type<tc>, window_params = [{transform_indices = @transform_0, window_bounds = array<i64: 1>}, {transform_indices = @transform_1, window_bounds = array<i64: 16, 128>}, {transform_indices = @transform_2, window_bounds = array<i64: 16, 128>}, {transform_indices = @transform_3, window_bounds = array<i64: 16, 128>}]} {
    %c0 = arith.constant 0 : index
    %0 = memref.load %arg1[%c0] : memref<1xf32, #tpu.memory_space<smem>>
    %c0_0 = arith.constant 0 : index
    %c0_1 = arith.constant 0 : index
    %1 = vector.load %arg2[%c0_0, %c0_1] : memref<16x128xf32, #tpu.memory_space<vmem>>, vector<16x128xf32>
    %c0_2 = arith.constant 0 : index
    %c0_3 = arith.constant 0 : index
    %2 = vector.load %arg3[%c0_2, %c0_3] : memref<16x128xf32, #tpu.memory_space<vmem>>, vector<16x128xf32>
    %3 = vector.broadcast %0 : f32 to vector<16x128xf32>
    %4 = arith.mulf %1, %3 : vector<16x128xf32>
    %cst = arith.constant 1.000000e+00 : f32
    %5 = arith.subf %cst, %0 : f32
    %6 = vector.broadcast %5 : f32 to vector<16x128xf32>
    %7 = arith.mulf %2, %6 : vector<16x128xf32>
    %8 = arith.addf %4, %7 : vector<16x128xf32>
    %c0_4 = arith.constant 0 : index
    %c0_5 = arith.constant 0 : index
    %9 = vector.load %arg4[%c0_4, %c0_5] : memref<16x128xf32, #tpu.memory_space<vmem>>, vector<16x128xf32>
    tpu.vector_store %arg4[%c0_4, %c0_5], %8 {strides = array<i32>} : memref<16x128xf32, #tpu.memory_space<vmem>>, vector<16x128xf32>,
    return
  }
  func.func @transform_0(%arg0: i32) -> i32 {
    %c0_i32 = arith.constant 0 : i32
    %c0_i32_0 = arith.constant 0 : i32
    return %c0_i32 : i32
  }
  func.func @transform_1(%arg0: i32) -> (i32, i32) {
    %c0_i32 = arith.constant 0 : i32
    %c0_i32_0 = arith.constant 0 : i32
    return %arg0, %c0_i32 : i32, i32
  }
  func.func @transform_2(%arg0: i32) -> (i32, i32) {
    %c0_i32 = arith.constant 0 : i32
    %c0_i32_0 = arith.constant 0 : i32
    return %arg0, %c0_i32 : i32, i32
  }
  func.func @transform_3(%arg0: i32) -> (i32, i32) {
    %c0_i32 = arith.constant 0 : i32
    %c0_i32_0 = arith.constant 0 : i32
    return %arg0, %c0_i32 : i32, i32
  }
}

</mosaic_0001>

<bundles_post_ra>
// kernel: _ema_update_impl.1
= control target key start
LH: loop header
LB: loop body
LE: loop exit
PB: predicated region body
PF: predicated region fallthrough
CT: control target
= control target key end

     0   :  { %s79_s0 = inlined_call_operand.<no memory space> [shape: f32[1], index: 0, kind: input, shape index: {}]   ;;  %s80_s1 = inlined_call_operand.vmem [shape: f32[16,128], index: 1, kind: input, shape index: {}, may-alias: {1,3}]   ;;  %s81_s2 = inlined_call_operand.vmem [shape: f32[16,128], index: 2, kind: input, shape index: {}]   ;;  %s82_s3 = inlined_call_operand.vmem [shape: f32[16,128], index: 3, kind: output, shape index: {}, may-alias: {1,3}]  }
   0x1   :  { %v16_v0 = vld [vmem:[%s80_s1] sm:$0xff]  ;;  %v20_v2 = vstv %s79_s0  ;;  %s23_s20 = ssub.f32 1.0, %s79_s0  ;;  %v17_v3 = vld [vmem:[%s80_s1 + $0x8] sm:$0xff] }
   0x2   :  { %v18_v1 = vld [vmem:[%s81_s2] sm:$0xff]  ;;  %v21_v4 = vmul.f32 %v20_v2, %v16_v0  ;;  %v19_v5 = vld [vmem:[%s81_s2 + $0x8] sm:$0xff]  ;;  %v22_v6 = vmul.f32 %v20_v2, %v17_v3 }
   0x3   :  { %v24_v7 = vstv %s23_s20 }
   0x4   :  { %v25_v8 = vmul.f32 %v24_v7, %v18_v1  ;;  %v26_v9 = vmul.f32 %v24_v7, %v19_v5 }
   0x6   :  { %v27_v10 = vadd.f32 %v25_v8, %v21_v4  ;;  %v28_v11 = vadd.f32 %v26_v9, %v22_v6 }
   0x8   :  { %29 = vst [vmem:[%s82_s3] sm:$0xff] %v27_v10  ;;  %30 = vst [vmem:[%s82_s3 + $0x8] sm:$0xff] %v28_v11 }

</bundles_post_ra>
